<compile_context>
chip_gen: v7x
topology: tpu7x:2x2x1
jax: 0.10.0
libtpu: 0.0.40
codegen_flags: <defaults>
</compile_context>

<pallas_src>
import jax
import jax.numpy as jnp
from jax.experimental import pallas as pl
from jax.experimental.pallas import tpu as pltpu


def _round_up(n: int, m: int) -> int:
    return (n + m - 1) // m * m


def _pad_and_tile(d: int, max_tile: int):
    """Return (padded_dim, tile) with padded_dim % tile == 0, tile % 128 == 0."""
    d_p = _round_up(d, 128)
    if d_p <= max_tile:
        return d_p, d_p
    d_p = _round_up(d_p, max_tile)
    return d_p, max_tile


def ensemble_kernel(w_ref, x_ref, Wt_ref, b_ref, o_ref, weff_ref, beff_ref, acc_ref):
    """Grid = (N_tiles, K_tiles, M); one step = one ensemble member for one tile.

    w_ref   : [M]        ensemble mixing weights (SMEM, whole array resident)
    x_ref   : [Bp, tk]   input K-tile (changes with k only)
    Wt_ref  : [tk, tn]   this member's weight tile, pre-transposed (member dim squeezed)
    b_ref   : [1, tn]    this member's bias tile
    o_ref   : [Bp, tn]   output tile (resident across k and m)
    weff_ref: [tk, tn]   VMEM scratch: effective weight accumulator (over m)
    beff_ref: [1, tn]    VMEM scratch: effective bias accumulator (over m)
    acc_ref : [Bp, tn]   VMEM scratch: output accumulator (over k)
    """
    k = pl.program_id(1)
    m = pl.program_id(2)
    nk = pl.num_programs(1)
    nm = pl.num_programs(2)

    @pl.when(m == 0)
    def _():
        weff_ref[...] = jnp.zeros_like(weff_ref)

    @pl.when(jnp.logical_and(m == 0, k == 0))
    def _():
        beff_ref[...] = jnp.zeros_like(beff_ref)

    wm = w_ref[m]  # scalar read from SMEM
    # Weighted reduction of the (already transposed) member weight tile (VPU work,
    # hidden under the DMA of the next member's weight tile).
    weff_ref[...] += wm * Wt_ref[...]

    # Bias only depends on the N tile; accumulate it once per n (during k == 0).
    @pl.when(k == 0)
    def _():
        beff_ref[...] += wm * b_ref[...]

    # Member loop for this (k, n) tile is done -> one MXU pass with W_eff tile.
    @pl.when(m == nm - 1)
    def _():
        contrib = jnp.dot(
            x_ref[...], weff_ref[...], preferred_element_type=jnp.float32
        )

        @pl.when(k == 0)
        def _():
            acc_ref[...] = contrib

        @pl.when(k > 0)
        def _():
            acc_ref[...] += contrib

        @pl.when(k == nk - 1)
        def _():
            o_ref[...] = acc_ref[...] + beff_ref[...]


def dynamic_ensemble_forward(x, W, b, weights, *, max_tile=512):
    """x: [B, D_in] f32, W: [M, D_out, D_in] f32, b: [M, D_out] f32, weights: [M] f32."""
    B, D_in = x.shape
    M, D_out, _ = W.shape

    # Pad to lane-dense, (8,128)-aligned, tile-divisible shapes (zero padding is exact).
    B_p = _round_up(B, 8)
    D_in_p, tk = _pad_and_tile(D_in, max_tile)
    D_out_p, tn = _pad_and_tile(D_out, max_tile)

    x_p = jnp.pad(x, ((0, B_p - B), (0, D_in_p - D_in)))
    Wt = jnp.transpose(W, (0, 2, 1))  # [M, D_in, D_out] -> no in-kernel .T
    Wt_p = jnp.pad(Wt, ((0, 0), (0, D_in_p - D_in), (0, D_out_p - D_out)))
    b_p = jnp.pad(b, ((0, 0), (0, D_out_p - D_out)))[:, None, :]  # [M, 1, D_out_p]

    grid = (D_out_p // tn, D_in_p // tk, M)

    out_p = pl.pallas_call(
        ensemble_kernel,
        out_shape=jax.ShapeDtypeStruct((B_p, D_out_p), jnp.float32),
        grid_spec=pltpu.PrefetchScalarGridSpec(
            num_scalar_prefetch=0,
            grid=grid,
            in_specs=[
                # ensemble mixing weights: small vector, resident in SMEM
                pl.BlockSpec(memory_space=pltpu.MemorySpace.SMEM),
                # x: one K tile of the padded input (resident across n-inner m loop)
                pl.BlockSpec((B_p, tk), lambda n, k, m: (0, k)),
                # W^T: one member's (tk, tn) weight tile per step (member dim squeezed)
                pl.BlockSpec((None, tk, tn), lambda n, k, m: (m, k, n)),
                # b: one member's bias tile per step
                pl.BlockSpec((None, 1, tn), lambda n, k, m: (m, 0, n)),
            ],
            out_specs=pl.BlockSpec((B_p, tn), lambda n, k, m: (0, n)),
            scratch_shapes=[
                pltpu.VMEM((tk, tn), jnp.float32),   # W_eff accumulator
                pltpu.VMEM((1, tn), jnp.float32),    # b_eff accumulator
                pltpu.VMEM((B_p, tn), jnp.float32),  # output accumulator over k
            ],
        ),
        compiler_params=pltpu.CompilerParams(
            # n (output tile) is independent; k and m are reductions.
            dimension_semantics=("parallel", "arbitrary", "arbitrary"),
        ),
    )(weights, x_p, Wt_p, b_p)

    return out_p[:B, :D_out]


def _reference(x, W, b, weights):
    member_outs = jnp.einsum("bi,moi->mbo", x, W) + b[:, None, :]  # [M, B, D_out]
    return jnp.sum(member_outs * weights[:, None, None], axis=0)   # [B, D_out]


if __name__ == "__main__":
    # Small shapes consistent with the module's forward:
    # M ensemble members, each a Linear(D_in -> D_out), batch B.
    B, D_in, D_out, M = 8, 32, 16, 3

    key = jax.random.PRNGKey(0)
    kx, kW, kb = jax.random.split(key, 3)

    x = jax.random.normal(kx, (B, D_in), dtype=jnp.float32)
    W = jax.random.normal(kW, (M, D_out, D_in), dtype=jnp.float32) * 0.1
    b = jax.random.normal(kb, (M, D_out), dtype=jnp.float32) * 0.1
    # add_member() rebalances so all members share equal weight = 1/M after M adds.
    weights = jnp.full((M,), 1.0 / M, dtype=jnp.float32)

    out = dynamic_ensemble_forward(x, W, b, weights)
    out = jax.block_until_ready(out)

    ref = _reference(x, W, b, weights)
    assert out.shape == (B, D_out)
    assert jnp.allclose(out, ref, atol=1e-5, rtol=1e-5), "mismatch vs reference"

    # Secondary check: force multi-tile K/N path (max_tile=128) to validate the
    # tiled accumulation, still at tiny/fast shapes.
    B2, D_in2, D_out2, M2 = 5, 200, 150, 4
    kx2, kW2, kb2, kw2 = jax.random.split(jax.random.PRNGKey(1), 4)
    x2 = jax.random.normal(kx2, (B2, D_in2), dtype=jnp.float32)
    W2 = jax.random.normal(kW2, (M2, D_out2, D_in2), dtype=jnp.float32) * 0.05
    b2 = jax.random.normal(kb2, (M2, D_out2), dtype=jnp.float32) * 0.05
    w2 = jax.nn.softmax(jax.random.normal(kw2, (M2,), dtype=jnp.float32))
    out2 = jax.block_until_ready(
        dynamic_ensemble_forward(x2, W2, b2, w2, max_tile=128)
    )
    ref2 = _reference(x2, W2, b2, w2)
    assert jnp.allclose(out2, ref2, atol=1e-4, rtol=1e-4), "tiled mismatch vs reference"

    print("KERNEL_OK")
</pallas_src>

<mosaic_0001>
module attributes {stable_mosaic.version = 11 : i64} {
  func.func @ensemble_kernel(%arg0: i32, %arg1: i32, %arg2: i32, %arg3: memref<3xf32, #tpu.memory_space<smem>>, %arg4: memref<8x128xf32, #tpu.memory_space<vmem>>, %arg5: memref<1x128x128xf32, #tpu.memory_space<vmem>>, %arg6: memref<1x1x128xf32, #tpu.memory_space<vmem>>, %arg7: memref<8x128xf32, #tpu.memory_space<vmem>>, %arg8: memref<128x128xf32, #tpu.memory_space<vmem>>, %arg9: memref<1x128xf32, #tpu.memory_space<vmem>>, %arg10: memref<8x128xf32, #tpu.memory_space<vmem>>) attributes {dimension_semantics = [#tpu.dimension_semantics<parallel>, #tpu.dimension_semantics<arbitrary>, #tpu.dimension_semantics<arbitrary>], iteration_bounds = array<i64: 1, 1, 3>, scalar_prefetch = 0 : i64, scratch_operands = 3 : i64, tpu.core_type = #tpu.core_type<tc>, window_params = [{transform_indices = @transform_0, window_bounds = array<i64: 3>}, {transform_indices = @transform_1, window_bounds = array<i64: 8, 128>}, {transform_indices = @transform_2, window_bounds = array<i64: 1, 128, 128>}, {transform_indices = @transform_3, window_bounds = array<i64: 1, 1, 128>}, {transform_indices = @transform_4, window_bounds = array<i64: 8, 128>}]} {
    %c0_i32 = arith.constant 0 : i32
    %0 = arith.cmpi eq, %arg2, %c0_i32 : i32
    %1 = arith.extui %0 : i1 to i32
    %c0_i32_0 = arith.constant 0 : i32
    %2 = arith.cmpi ne, %1, %c0_i32_0 : i32
    scf.if %2 {
      %cst = arith.constant 0.000000e+00 : f32
      %23 = vector.broadcast %cst : f32 to vector<128x128xf32>
      %c0_13 = arith.constant 0 : index
      %c0_14 = arith.constant 0 : index
      %24 = vector.load %arg8[%c0_13, %c0_14] : memref<128x128xf32, #tpu.memory_space<vmem>>, vector<128x128xf32>
      tpu.vector_store %arg8[%c0_13, %c0_14], %23 {strides = array<i32>} : memref<128x128xf32, #tpu.memory_space<vmem>>, vector<128x128xf32>,
    } else {
    }
    %c0_i32_1 = arith.constant 0 : i32
    %3 = arith.cmpi eq, %arg2, %c0_i32_1 : i32
    %c0_i32_2 = arith.constant 0 : i32
    %4 = arith.cmpi eq, %arg1, %c0_i32_2 : i32
    %5 = arith.andi %3, %4 : i1
    %6 = arith.extui %5 : i1 to i32
    %c0_i32_3 = arith.constant 0 : i32
    %7 = arith.cmpi ne, %6, %c0_i32_3 : i32
    scf.if %7 {
      %cst = arith.constant 0.000000e+00 : f32
      %23 = vector.broadcast %cst : f32 to vector<1x128xf32>
      %c0_13 = arith.constant 0 : index
      %c0_14 = arith.constant 0 : index
      %24 = vector.load %arg9[%c0_13, %c0_14] : memref<1x128xf32, #tpu.memory_space<vmem>>, vector<1x128xf32>
      tpu.vector_store %arg9[%c0_13, %c0_14], %23 {strides = array<i32>} : memref<1x128xf32, #tpu.memory_space<vmem>>, vector<1x128xf32>,
    } else {
    }
    %8 = arith.index_cast %arg2 : i32 to index
    %9 = memref.load %arg3[%8] : memref<3xf32, #tpu.memory_space<smem>>
    %c0 = arith.constant 0 : index
    %c0_4 = arith.constant 0 : index
    %10 = vector.load %arg8[%c0, %c0_4] : memref<128x128xf32, #tpu.memory_space<vmem>>, vector<128x128xf32>
    %c0_5 = arith.constant 0 : index
    %c0_6 = arith.constant 0 : index
    %c0_7 = arith.constant 0 : index
    %11 = vector.load %arg5[%c0_5, %c0_6, %c0_7] : memref<1x128x128xf32, #tpu.memory_space<vmem>>, vector<1x128x128xf32>
    %12 = vector.shape_cast %11 : vector<1x128x128xf32> to vector<128x128xf32>
    %13 = vector.broadcast %9 : f32 to vector<128x128xf32>
    %14 = arith.mulf %13, %12 : vector<128x128xf32>
    %15 = arith.addf %10, %14 : vector<128x128xf32>
    %c0_8 = arith.constant 0 : index
    %c0_9 = arith.constant 0 : index
    %16 = vector.load %arg8[%c0_8, %c0_9] : memref<128x128xf32, #tpu.memory_space<vmem>>, vector<128x128xf32>
    tpu.vector_store %arg8[%c0_8, %c0_9], %15 {strides = array<i32>} : memref<128x128xf32, #tpu.memory_space<vmem>>, vector<128x128xf32>,
    %c0_i32_10 = arith.constant 0 : i32
    %17 = arith.cmpi eq, %arg1, %c0_i32_10 : i32
    %18 = arith.extui %17 : i1 to i32
    %c0_i32_11 = arith.constant 0 : i32
    %19 = arith.cmpi ne, %18, %c0_i32_11 : i32
    scf.if %19 {
      %c0_13 = arith.constant 0 : index
      %c0_14 = arith.constant 0 : index
      %23 = vector.load %arg9[%c0_13, %c0_14] : memref<1x128xf32, #tpu.memory_space<vmem>>, vector<1x128xf32>
      %c0_15 = arith.constant 0 : index
      %c0_16 = arith.constant 0 : index
      %c0_17 = arith.constant 0 : index
      %24 = vector.load %arg6[%c0_15, %c0_16, %c0_17] : memref<1x1x128xf32, #tpu.memory_space<vmem>>, vector<1x1x128xf32>
      %25 = vector.shape_cast %24 : vector<1x1x128xf32> to vector<1x128xf32>
      %26 = vector.broadcast %9 : f32 to vector<1x128xf32>
      %27 = arith.mulf %26, %25 : vector<1x128xf32>
      %28 = arith.addf %23, %27 : vector<1x128xf32>
      %c0_18 = arith.constant 0 : index
      %c0_19 = arith.constant 0 : index
      %29 = vector.load %arg9[%c0_18, %c0_19] : memref<1x128xf32, #tpu.memory_space<vmem>>, vector<1x128xf32>
      tpu.vector_store %arg9[%c0_18, %c0_19], %28 {strides = array<i32>} : memref<1x128xf32, #tpu.memory_space<vmem>>, vector<1x128xf32>,
    } else {
    }
    %c2_i32 = arith.constant 2 : i32
    %20 = arith.cmpi eq, %arg2, %c2_i32 : i32
    %21 = arith.extui %20 : i1 to i32
    %c0_i32_12 = arith.constant 0 : i32
    %22 = arith.cmpi ne, %21, %c0_i32_12 : i32
    scf.if %22 {
      %c0_13 = arith.constant 0 : index
      %c0_14 = arith.constant 0 : index
      %23 = vector.load %arg4[%c0_13, %c0_14] : memref<8x128xf32, #tpu.memory_space<vmem>>, vector<8x128xf32>
      %c0_15 = arith.constant 0 : index
      %c0_16 = arith.constant 0 : index
      %24 = vector.load %arg8[%c0_15, %c0_16] : memref<128x128xf32, #tpu.memory_space<vmem>>, vector<128x128xf32>
      %cst = arith.constant dense<0.000000e+00> : vector<8x128xf32>
      %25 = tpu.matmul %23, %24, %cst {dimension_numbers = #tpu.dot_dimension_numbers<[1], [0], [0], [1], [0, 0, 1, 1], [], []>} : vector<8x128xf32>, vector<128x128xf32>, vector<8x128xf32> -> vector<8x128xf32>
      %c0_i32_17 = arith.constant 0 : i32
      %26 = arith.cmpi eq, %arg1, %c0_i32_17 : i32
      %27 = arith.extui %26 : i1 to i32
      %c0_i32_18 = arith.constant 0 : i32
      %28 = arith.cmpi ne, %27, %c0_i32_18 : i32
      scf.if %28 {
        %c0_23 = arith.constant 0 : index
        %c0_24 = arith.constant 0 : index
        %35 = vector.load %arg10[%c0_23, %c0_24] : memref<8x128xf32, #tpu.memory_space<vmem>>, vector<8x128xf32>
        tpu.vector_store %arg10[%c0_23, %c0_24], %25 {strides = array<i32>} : memref<8x128xf32, #tpu.memory_space<vmem>>, vector<8x128xf32>,
      } else {
      }
      %c0_i32_19 = arith.constant 0 : i32
      %29 = arith.cmpi sgt, %arg1, %c0_i32_19 : i32
      %30 = arith.extui %29 : i1 to i32
      %c0_i32_20 = arith.constant 0 : i32
      %31 = arith.cmpi ne, %30, %c0_i32_20 : i32
      scf.if %31 {
        %c0_23 = arith.constant 0 : index
        %c0_24 = arith.constant 0 : index
        %35 = vector.load %arg10[%c0_23, %c0_24] : memref<8x128xf32, #tpu.memory_space<vmem>>, vector<8x128xf32>
        %36 = arith.addf %35, %25 : vector<8x128xf32>
        %c0_25 = arith.constant 0 : index
        %c0_26 = arith.constant 0 : index
        %37 = vector.load %arg10[%c0_25, %c0_26] : memref<8x128xf32, #tpu.memory_space<vmem>>, vector<8x128xf32>
        tpu.vector_store %arg10[%c0_25, %c0_26], %36 {strides = array<i32>} : memref<8x128xf32, #tpu.memory_space<vmem>>, vector<8x128xf32>,
      } else {
      }
      %c0_i32_21 = arith.constant 0 : i32
      %32 = arith.cmpi eq, %arg1, %c0_i32_21 : i32
      %33 = arith.extui %32 : i1 to i32
      %c0_i32_22 = arith.constant 0 : i32
      %34 = arith.cmpi ne, %33, %c0_i32_22 : i32
      scf.if %34 {
        %c0_23 = arith.constant 0 : index
        %c0_24 = arith.constant 0 : index
        %35 = vector.load %arg10[%c0_23, %c0_24] : memref<8x128xf32, #tpu.memory_space<vmem>>, vector<8x128xf32>
        %c0_25 = arith.constant 0 : index
        %c0_26 = arith.constant 0 : index
        %36 = vector.load %arg9[%c0_25, %c0_26] : memref<1x128xf32, #tpu.memory_space<vmem>>, vector<1x128xf32>
        %37 = vector.broadcast %36 : vector<1x128xf32> to vector<8x128xf32>
        %38 = arith.addf %35, %37 : vector<8x128xf32>
        %c0_27 = arith.constant 0 : index
        %c0_28 = arith.constant 0 : index
        %39 = vector.load %arg7[%c0_27, %c0_28] : memref<8x128xf32, #tpu.memory_space<vmem>>, vector<8x128xf32>
        tpu.vector_store %arg7[%c0_27, %c0_28], %38 {strides = array<i32>} : memref<8x128xf32, #tpu.memory_space<vmem>>, vector<8x128xf32>,
      } else {
      }
    } else {
    }
    return
  }
  func.func @transform_0(%arg0: i32, %arg1: i32, %arg2: i32) -> i32 {
    %c0_i32 = arith.constant 0 : i32
    %c0_i32_0 = arith.constant 0 : i32
    return %c0_i32 : i32
  }
  func.func @transform_1(%arg0: i32, %arg1: i32, %arg2: i32) -> (i32, i32) {
    %c0_i32 = arith.constant 0 : i32
    %c0_i32_0 = arith.constant 0 : i32
    return %c0_i32, %arg1 : i32, i32
  }
  func.func @transform_2(%arg0: i32, %arg1: i32, %arg2: i32) -> (i32, i32, i32) {
    %c0_i32 = arith.constant 0 : i32
    return %arg2, %arg1, %arg0 : i32, i32, i32
  }
  func.func @transform_3(%arg0: i32, %arg1: i32, %arg2: i32) -> (i32, i32, i32) {
    %c0_i32 = arith.constant 0 : i32
    %c0_i32_0 = arith.constant 0 : i32
    return %arg2, %c0_i32, %arg0 : i32, i32, i32
  }
  func.func @transform_4(%arg0: i32, %arg1: i32, %arg2: i32) -> (i32, i32) {
    %c0_i32 = arith.constant 0 : i32
    %c0_i32_0 = arith.constant 0 : i32
    return %c0_i32, %arg0 : i32, i32
  }
}

</mosaic_0001>

<bundles_post_ra>
// kernel: tpu_custom_call.1
= control target key start
LH: loop header
LB: loop body
LE: loop exit
PB: predicated region body
PF: predicated region fallthrough
CT: control target
= control target key end

     0   :  { %9 = vsyncpa [#allocation8], 0  ;;  %s1303_s0 = inlined_call_operand.hbm [shape: f32[3], index: 0, kind: input, shape index: {}]   ;;  %s1304_s1 = inlined_call_operand.hbm [shape: f32[8,128], index: 1, kind: input, shape index: {}]   ;;  %s1305_s2 = inlined_call_operand.hbm [shape: f32[3,128,128], index: 2, kind: input, shape index: {}]   ;;  %s1306_s3 = inlined_call_operand.vmem [shape: f32[3,1,128], index: 3, kind: input, shape index: {}]   ;;  %s1307_s4 = inlined_call_operand.hbm [shape: f32[8,128], index: 4, kind: output, shape index: {}]  }
   0x1   :  { %10 = vsyncpa [#allocation6], 0 }
   0x2   :  { %11 = vsyncpa [#allocation11], 0 }
   0x3   :  { %13 = vsyncpa [#allocation11 + $0x1], 0 }
   0x4   :  { %14 = vsyncpa [#allocation7], 0  ;;  %s1024_s15 = smov 0   ;;  %s1026_s16 = smov 0  }
   0x5   :  { %s1028_s17 = smov 0   ;;  %s1030_s18 = smov 0  }
   0x6   :  { %s1032_s19 = smov 0   ;;  %s1034_s20 = smov 0  }
   0x7 LB: > { %s639_s21 = sadd.s32 4294967295, %s986_s20   ;;  %s97_s22 = sadd.s32 1, %s974_s17  ;;  %s986_s20 = sphi %s1034_s20, %s20_s20   ;;  %s982_s19 = sphi %s1032_s19, %s1323_s19   ;;  %s978_s18 = sphi %s1030_s18, %s1322_s18   ;;  %s974_s17 = sphi %s1028_s17, %s1321_s17   ;;  %s970_s16 = sphi %s1026_s16, %s1320_s16   ;;  %s966_s15 = sphi %s1024_s15, %s1319_s15  }
   0x8   : > { %p104_p0 = scmp.ne.s32.totalorder %s974_s17, %s970_s16  ;;  %p105_p1 = scmp.eq.s32.totalorder %s986_s20, 0 }
   0x9   : > { %p110_p2 = scmp.ne.s32.totalorder %s970_s16, %s966_s15  ;;  %p1060_p3 = scmp.eq.s32.totalorder %s639_s21, 0 }
   0xa   : > { %p106_p4 = por %p105_p1, %p104_p0  ;;  %p640_p5 = scmp.ge.s32.totalorder %s986_s20, 1 }
   0xb   : > { %s1311_s23 = scalar_select %p1060_p3, 1, 0 }
   0xc   : > { %p1067_p6 = por %p1060_p3, %p110_p2  ;;  %p175_p7 = scmp.lt.s32.totalorder %s986_s20, 4 }
   0xd   : > { %p764_p9 = scmp.lt.s32.totalorder %s986_s20, 3  ;;  %s988_s26 = smov [#allocation9]  }
   0xe   : > { %s1312_s24 = scalar_select %p1067_p6, 1, 0 }
   0xf   : > { %p1072_p8 = pnand %p640_p5, %p175_p7  ;;  %s199_s27 = sshll.u32 %s988_s26, 4  ;;  %s1083_s27 = int_to_ptr.vmem [resolvable:$true] %s199_s27 }
  0x10   : > { %p1079_p11 = pnand %p764_p9, %p106_p4  ;;  %s32_s30 = sadd.s32 1, %s982_s19 }
  0x11   : > { %p751_p10 = pneg %p1072_p8  ;;  %s827_s7 = scalar_lea.hbm %s1303_s0, 16 }
  0x12   : > { %p828_p13 = scmp.ne.s32.totalorder %s1303_s0, %s827_s7  ;;  %p834_p4 = scmp.lt.u32.totalorder %s827_s7, %s1303_s0 }
  0x13   : > { %p1087_p12 = pnand %p751_p10, %p1060_p3 }
  0x15   : > { %p829_p0 = pneg %p1087_p12 }
  0x17   : > { %p830_p1 = pnand %p829_p0, %p828_p13 }
  0x19   : > { %p831_p2 = pneg %p830_p1 }
  0x1b   : > { %p836_p5 = pnand %p834_p4, %p831_p2 }
  0x1d   : > { %839 = shalt.err (!%p836_p5)
}
  0x1e   : > { %s989_s12 = smov [#allocation5]   ;;  %s840_s5 = scalar_lea.hbm %s1304_s1, 128 }
  0x1f   : > { %754 = dma.hbm_to_smem (!%p1087_p12), %s1303_s0, 16, %s989_s12, [#allocation8]  }
  0x20   : > { %p841_p7 = scmp.ne.s32.totalorder %s1304_s1, %s840_s5  ;;  %p847_p13 = scmp.lt.u32.totalorder %s840_s5, %s1304_s1 }
  0x22   : > { %p843_p9 = pnand %p841_p7, %p829_p0 }
  0x24   : > { %p844_p10 = pneg %p843_p9 }
  0x26   : > { %p849_p1 = pnand %p847_p13, %p844_p10 }
  0x28   : > { %852 = shalt.err (!%p849_p1)
}
  0x29   : > { %s853_s10 = scalar_lea.vmem %s1083_s27, 128  ;;  %p861_p6 = scmp.lt.s32.totalorder %s1083_s27, %s1083_s27 }
  0x2a   : > { %p854_p2 = scmp.ne.s32.totalorder %s1083_s27, %s853_s10  ;;  %p862_p7 = scmp.lt.s32.totalorder %s853_s10, %s853_s10 }
  0x2c   : > { %p856_p4 = pnand %p854_p2, %p829_p0  ;;  %p863_p9 = por %p862_p7, %p861_p6 }
  0x2e   : > { %p857_p5 = pneg %p856_p4 }
  0x30   : > { %p864_p3 = pnand %p863_p9, %p857_p5 }
  0x32   : > { %867 = shalt.err (!%p864_p3)
}
  0x33   : > { %757 = dma.hbm_to_vmem [thread:$0]  (!%p1087_p12), %s1304_s1, 128, %s1083_s27, [#allocation6]  }
  0x34   : > { %p33_p0 = scmp.ge.s32.totalorder %s32_s30, 3  ;;  %s210_s13 = sand.u32 1, %s974_s17  }
  0x35   : > { %s644_s14 = sshll.u32 %s210_s13, 7  ;;  %s659_s29 = sshll.u32 %s982_s19, 11 }
  0x36   : > { %s1325_s30 = smov (%p33_p0, %s32_s30), 0  ;;  %s1149_s6 = scalar_lea.hbm %s1305_s2, %s659_s29 }
  0x37   : > { %s90_s15 = ssub.s32 %s982_s19, %s1325_s30  ;;  %s214_s27 = scalar_lea.vmem [#allocation10], %s644_s14 }
  0x38   : > { %p95_p3 = scmp.eq.s32.totalorder %s90_s15, 0  ;;  %s224_s8 = sshll.u32 %s214_s27, 4  ;;  %s1151_s8 = int_to_ptr.vmem [resolvable:$true] %s224_s8 }
  0x39   : > { %s1158_s9 = scalar_lea.sflag [#allocation11], %s210_s13  ;;  %s868_s10 = scalar_lea.hbm %s1149_s6, 2048 }
  0x3a   : > { %s1156_s7 = scalar_select %p95_p3, %s974_s17, %s97_s22  }
  0x3b   : > { %p869_p6 = scmp.ne.s32.totalorder %s1149_s6, %s868_s10  ;;  %p870_p12 = pneg %p1079_p11 }
  0x3c   : > { %s873_s14 = scalar_lea.hbm %s1305_s2, 6144  ;;  %p874_p1 = scmp.lt.u32.totalorder %s1149_s6, %s1305_s2 }
  0x3d   : > { %p871_p10 = pnand %p870_p12, %p869_p6  ;;  %p875_p2 = scmp.lt.u32.totalorder %s873_s14, %s868_s10 }
  0x3e   : > { %p877_p5 = scmp.lt.u32.totalorder %s868_s10, %s1149_s6 }
  0x3f   : > { %p872_p13 = pneg %p871_p10  ;;  %p876_p4 = por %p875_p2, %p874_p1 }
  0x41   : > { %p878_p7 = por %p877_p5, %p876_p4 }
  0x43   : > { %p879_p9 = pnand %p878_p7, %p872_p13 }
  0x45   : > { %882 = shalt.err (!%p879_p9)
}
  0x46   : > { %s883_s22 = scalar_lea.vmem %s1151_s8, 2048  ;;  %s990_s13 = smov [#allocation10]  }
  0x47   : > { %p884_p0 = scmp.ne.s32.totalorder %s1151_s8, %s883_s22  ;;  %s888_s26 = sshll.u32 %s990_s13, 4  ;;  %s889_s26 = int_to_ptr.vmem [resolvable:$false] %s888_s26 }
  0x48   : > { %s890_s5 = scalar_lea.vmem %s889_s26, 4096  ;;  %p891_p10 = scmp.lt.s32.totalorder %s1151_s8, %s889_s26 }
  0x49   : > { %p886_p3 = pnand %p884_p0, %p870_p12  ;;  %p892_p1 = scmp.lt.s32.totalorder %s890_s5, %s883_s22 }
  0x4b   : > { %p887_p6 = pneg %p886_p3  ;;  %p893_p2 = por %p892_p1, %p891_p10 }
  0x4d   : > { %p894_p4 = pnand %p893_p2, %p887_p6 }
  0x4f   : > { %897 = shalt.err (!%p894_p4)
}
  0x50   : > { %s991_s27 = smov 128   ;;  %s992_s10 = smov 8  }
  0x51   : > { %761 = dma.hbm_to_vmem [thread:$0]  (!%p1079_p11), %s1149_s6, 2048, %s1151_s8, %s1158_s9, %s991_s27, %s991_s27, %s992_s10  }
  0x52   : > { %245 = sbr.rel (%p1072_p8) target bundleno = 409 (0x199), region = 36  ;;  %p1316_p12 = scmp.ne.s32.totalorder (!%p1072_p8), %s1311_s23, 0 }
  0x59   : > { %949 = dma.done.wait (%p1316_p12), [#allocation8], 16  }
  0x5a   : > { %951 = vsyncadd (%p1316_p12), [#allocation8], 4294967280 }
  0x5b   : > { %953 = dma.done.wait (%p1316_p12), [#allocation6], 128  }
  0x5c   : > { %955 = vsyncadd (%p1316_p12), [#allocation6], 4294967168  ;;  %s255_s11 = sand.u32 1, %s970_s16   ;;  %p1317_p8 = scmp.ne.s32.totalorder %s1312_s24, 0 }
  0x5d   : > { %s650_s28 = sshll.u32 %s255_s11, 7  ;;  %s256_s6 = scalar_lea.sflag [#allocation11], %s255_s11 }
  0x5e   : > { %s1197_s8 = scalar_lea.vmem [#allocation10], %s650_s28 }
  0x5f   : > { %957 = dma.done.wait (%p1317_p8), %s256_s6, 2048  }
  0x60   : > { %959 = vsyncadd (%p1317_p8), %s256_s6, 4294965248 }
  0x61   : > { %264 = sfence }
  0x62   : > { %p287_p11 = scmp.lt.s32.totalorder %s978_s18, 2  ;;  %p293_p13 = scmp.eq.s32.totalorder %s978_s18, 0 }
  0x63   : > { %p651_p5 = scmp.ne.s32.totalorder %s978_s18, 0 }
  0x64   : > { %s1206_s23 = scalar_select %p287_p11, %s978_s18, 2 }
  0x65   : > { %296 = sbr.rel (%p651_p5) target bundleno = 110 (0x6e), region = 52  ;;  %v993_v0 = vmov (!%p651_p5), 0.0  }
  0x66   : > { %s292_s12 = scalar_lea.vmem %s1306_s3, %s1206_s23  ;;  %297 = vst [vmem:[#allocation2] sm:$0xff] (!%p651_p5), %v993_v0  ;;  %298 = vst [vmem:[#allocation2 + $0x8] sm:$0xff] (!%p651_p5), %v993_v0 }
  0x67   : > { %299 = vst [vmem:[#allocation2 + $0x10] sm:$0xff] (!%p651_p5), %v993_v0  ;;  %300 = vst [vmem:[#allocation2 + $0x18] sm:$0xff] (!%p651_p5), %v993_v0 }
  0x68   : > { %301 = vst [vmem:[#allocation2 + $0x20] sm:$0xff] (!%p651_p5), %v993_v0  ;;  %302 = vst [vmem:[#allocation2 + $0x28] sm:$0xff] (!%p651_p5), %v993_v0 }
  0x69   : > { %303 = vst [vmem:[#allocation2 + $0x30] sm:$0xff] (!%p651_p5), %v993_v0  ;;  %304 = vst [vmem:[#allocation2 + $0x38] sm:$0xff] (!%p651_p5), %v993_v0 }
  0x6a   : > { %305 = vst [vmem:[#allocation2 + $0x40] sm:$0xff] (!%p651_p5), %v993_v0  ;;  %306 = vst [vmem:[#allocation2 + $0x48] sm:$0xff] (!%p651_p5), %v993_v0 }
  0x6b   : > { %307 = vst [vmem:[#allocation2 + $0x50] sm:$0xff] (!%p651_p5), %v993_v0  ;;  %308 = vst [vmem:[#allocation2 + $0x58] sm:$0xff] (!%p651_p5), %v993_v0 }
  0x6c   : > { %309 = vst [vmem:[#allocation2 + $0x60] sm:$0xff] %v993_v0  ;;  %310 = vst [vmem:[#allocation2 + $0x68] sm:$0xff] %v993_v0 }
  0x6d   : > { %311 = vst [vmem:[#allocation2 + $0x70] sm:$0xff] %v993_v0  ;;  %312 = vst [vmem:[#allocation2 + $0x78] sm:$0xff] %v993_v0 }
  0x6e PF: > { %317 = sbr.rel (!%p293_p13) target bundleno = 117 (0x75), region = 56  ;;  %v994_v1 = vmov (%p293_p13), 0.0  }
  0x6f   : > { %318 = vst [vmem:[#allocation3] sm:$0x1] (%p293_p13), %v994_v1 }
  0x75 PF: > { %s319_s24 = sld [smem:[#allocation5 + %s978_s18]]  ;;  %v336_v2 = vld [vmem:[%s1197_s8] sm:$0xff]  ;;  %v337_v3 = vld [vmem:[%s1197_s8 + $0x8] sm:$0xff]  ;;  %v338_v4 = vld [vmem:[%s1197_s8 + $0x10] sm:$0xff]  ;;  %p653_p7 = scmp.ne.s32.totalorder %s978_s18, 2 }
  0x76   : > { %v320_v5 = vld [vmem:[#allocation2] sm:$0xff]  ;;  %v321_v6 = vld [vmem:[#allocation2 + $0x8] sm:$0xff]  ;;  %v322_v7 = vld [vmem:[#allocation2 + $0x10] sm:$0xff]  ;;  %vm996_vm0 = vmmov (!%p653_p7), 0  }
  0x77   : > { %v323_v8 = vld [vmem:[#allocation2 + $0x18] sm:$0xff]  ;;  %v339_v9 = vld [vmem:[%s1197_s8 + $0x18] sm:$0xff]  ;;  %v340_v10 = vld [vmem:[%s1197_s8 + $0x20] sm:$0xff] }
  0x78   : > { %v341_v11 = vld [vmem:[%s1197_s8 + $0x28] sm:$0xff]  ;;  %v342_v12 = vld [vmem:[%s1197_s8 + $0x30] sm:$0xff]  ;;  %v343_v13 = vld [vmem:[%s1197_s8 + $0x38] sm:$0xff] }
  0x79   : > { %v324_v15 = vld [vmem:[#allocation2 + $0x20] sm:$0xff]  ;;  %v325_v16 = vld [vmem:[#allocation2 + $0x28] sm:$0xff]  ;;  %v326_v17 = vld [vmem:[#allocation2 + $0x30] sm:$0xff] }
  0x7a   : > { %v327_v22 = vld [vmem:[#allocation2 + $0x38] sm:$0xff]  ;;  %v344_v23 = vld [vmem:[%s1197_s8 + $0x40] sm:$0xff]  ;;  %v328_v29 = vld [vmem:[#allocation2 + $0x40] sm:$0xff] }
  0x7b   : > { %v1224_v14 = vstv %s319_s24  ;;  %v345_v24 = vld [vmem:[%s1197_s8 + $0x48] sm:$0xff]  ;;  %v329_v30 = vld [vmem:[#allocation2 + $0x48] sm:$0xff]  ;;  %v346_v32 = vld [vmem:[%s1197_s8 + $0x50] sm:$0xff] }
  0x7c   : > { %v353_v18 = vmul.f32 %v1224_v14, %v336_v2  ;;  %v354_v19 = vmul.f32 %v1224_v14, %v337_v3  ;;  %v355_v20 = vmul.f32 %v1224_v14, %v338_v4  ;;  %v356_v21 = vmul.f32 %v1224_v14, %v339_v9  ;;  %v330_v31 = vld [vmem:[#allocation2 + $0x50] sm:$0xff]  ;;  %v347_v33 = vld [vmem:[%s1197_s8 + $0x58] sm:$0xff]  ;;  %v350_v40 = vld [vmem:[%s1197_s8 + $0x70] sm:$0xff] }
  0x7d   : > { %v357_v25 = vmul.f32 %v1224_v14, %v340_v10  ;;  %v358_v26 = vmul.f32 %v1224_v14, %v341_v11  ;;  %v359_v27 = vmul.f32 %v1224_v14, %v342_v12  ;;  %v360_v28 = vmul.f32 %v1224_v14, %v343_v13  ;;  %v348_v38 = vld [vmem:[%s1197_s8 + $0x60] sm:$0xff]  ;;  %v349_v39 = vld [vmem:[%s1197_s8 + $0x68] sm:$0xff]  ;;  %v332_v46 = vld [vmem:[#allocation2 + $0x60] sm:$0xff] }
  0x7e   : > { %v369_v34 = vadd.f32 %v353_v18, %v320_v5  ;;  %v370_v35 = vadd.f32 %v354_v19, %v321_v6  ;;  %v371_v36 = vadd.f32 %v355_v20, %v322_v7  ;;  %v372_v37 = vadd.f32 %v356_v21, %v323_v8  ;;  %v331_v45 = vld [vmem:[#allocation2 + $0x58] sm:$0xff]  ;;  %v351_v47 = vld [vmem:[%s1197_s8 + $0x78] sm:$0xff]  ;;  %v334_v53 = vld [vmem:[#allocation2 + $0x70] sm:$0xff] }
  0x7f   : > { %v373_v41 = vadd.f32 %v357_v25, %v324_v15  ;;  %v374_v42 = vadd.f32 %v358_v26, %v325_v16  ;;  %v375_v43 = vadd.f32 %v359_v27, %v326_v17  ;;  %v376_v44 = vadd.f32 %v360_v28, %v327_v22  ;;  %v333_v52 = vld [vmem:[#allocation2 + $0x68] sm:$0xff]  ;;  %v335_v54 = vld [vmem:[#allocation2 + $0x78] sm:$0xff]  ;;  %v404_v4 = vld [vmem:[#allocation3] sm:$0x1] }
  0x80   : > { %385 = vst [vmem:[#allocation2] sm:$0xff] %v369_v34  ;;  %386 = vst [vmem:[#allocation2 + $0x8] sm:$0xff] %v370_v35  ;;  %v361_v48 = vmul.f32 %v1224_v14, %v344_v23  ;;  %v362_v49 = vmul.f32 %v1224_v14, %v345_v24  ;;  %v363_v50 = vmul.f32 %v1224_v14, %v346_v32  ;;  %v405_v59 = vld [vmem:[%s292_s12] sm:$0x1]  ;;  %v995_v10 = vmov (!%p653_p7), 0.0|0.0  }
  0x81   : > { %387 = vst [vmem:[#allocation2 + $0x10] sm:$0xff] %v371_v36  ;;  %388 = vst [vmem:[#allocation2 + $0x18] sm:$0xff] %v372_v37  ;;  %v364_v51 = vmul.f32 %v1224_v14, %v347_v33  ;;  %v365_v55 = vmul.f32 %v1224_v14, %v348_v38  ;;  %v366_v56 = vmul.f32 %v1224_v14, %v349_v39  ;;  %713 = vmatprep.subr.bf16.mxu0 (!%p653_p7), %v995_v10  ;;  %v997_v13 = vmov (!%p653_p7), 0.0   ;;  %v413_v33 = vld [vmem:[#allocation9] sm:$0xff] (!%p653_p7) }
  0x82   : > { %389 = vst [vmem:[#allocation2 + $0x20] sm:$0xff] %v373_v41  ;;  %390 = vst [vmem:[#allocation2 + $0x28] sm:$0xff] %v374_v42  ;;  %v367_v57 = vmul.f32 %v1224_v14, %v350_v40  ;;  %v368_v58 = vmul.f32 %v1224_v14, %v351_v47  ;;  %v377_v60 = vadd.f32 %v361_v48, %v328_v29  ;;  %710 = vmatprep.mubr.msk.f32.mxu0 (!%p653_p7), %vm996_vm0, %v997_v13 }
  0x83   : > { %391 = vst [vmem:[#allocation2 + $0x30] sm:$0xff] %v375_v43  ;;  %392 = vst [vmem:[#allocation2 + $0x38] sm:$0xff] %v376_v44  ;;  %v378_v61 = vadd.f32 %v362_v49, %v329_v30  ;;  %v379_v62 = vadd.f32 %v363_v50, %v330_v31  ;;  %v380_v63 = vadd.f32 %v364_v51, %v331_v45  ;;  %412 = sbr.rel (%p653_p7) target bundleno = 384 (0x180), region = 64 }
  0x84   : > { %v381_v0 = vadd.f32 %v365_v55, %v332_v46  ;;  %v382_v1 = vadd.f32 %v366_v56, %v333_v52  ;;  %v383_v2 = vadd.f32 %v367_v57, %v334_v53  ;;  %v384_v3 = vadd.f32 %v368_v58, %v335_v54  ;;  %393 = vst [vmem:[#allocation2 + $0x40] sm:$0xff] %v377_v60 }
  0x85   : > { %394 = vst [vmem:[#allocation2 + $0x48] sm:$0xff] %v378_v61  ;;  %395 = vst [vmem:[#allocation2 + $0x50] sm:$0xff] %v379_v62  ;;  %v406_v5 = vmul.f32 %v405_v59, %v1224_v14 }
  0x86   : > { %396 = vst [vmem:[#allocation2 + $0x58] sm:$0xff] %v380_v63  ;;  %397 = vst [vmem:[#allocation2 + $0x60] sm:$0xff] %v381_v0 }
  0x87   : > { %398 = vst [vmem:[#allocation2 + $0x68] sm:$0xff] %v382_v1  ;;  %399 = vst [vmem:[#allocation2 + $0x70] sm:$0xff] %v383_v2  ;;  %v407_v6 = vadd.f32 %v406_v5, %v404_v4  ;;  %v414_v7 = vld [vmem:[#allocation2] sm:$0xff] (!%p653_p7)  ;;  %v415_v8 = vld [vmem:[#allocation2 + $0x8] sm:$0xff] (!%p653_p7) }
  0x88   : > { %400 = vst [vmem:[#allocation2 + $0x78] sm:$0xff] %v384_v3  ;;  %v416_v9 = vld [vmem:[#allocation2 + $0x10] sm:$0xff] (!%p653_p7)  ;;  %v714_v11 = vpack.c.bf16 (!%p653_p7), %v415_v8, %v414_v7  ;;  %v417_v12 = vld [vmem:[#allocation2 + $0x18] sm:$0xff] (!%p653_p7) }
  0x89   : > { %408 = vst [vmem:[#allocation3] sm:$0x1] %v407_v6  ;;  %v717_v14 = vpack.c.bf16 (!%p653_p7), %v417_v12, %v416_v9  ;;  %v418_v15 = vld [vmem:[#allocation2 + $0x20] sm:$0xff] (!%p653_p7)  ;;  %v419_v16 = vld [vmem:[#allocation2 + $0x28] sm:$0xff] (!%p653_p7) }
  0x8a   : > { %715 = vmatpush3.bf16.msra.mxu0 %v714_v11  ;;  %v720_v17 = vpack.c.bf16 %v419_v16, %v418_v15  ;;  %v420_v18 = vld [vmem:[#allocation2 + $0x30] sm:$0xff]  ;;  %v421_v19 = vld [vmem:[#allocation2 + $0x38] sm:$0xff] }
  0x8b   : > { %716 = vmatprep.subr.bf16.mxu0 %v995_v10  ;;  %v723_v20 = vpack.c.bf16 %v421_v19, %v420_v18  ;;  %v422_v21 = vld [vmem:[#allocation2 + $0x40] sm:$0xff] }
  0x8c   : > { %v423_v22 = vld [vmem:[#allocation2 + $0x48] sm:$0xff]  ;;  %v424_v24 = vld [vmem:[#allocation2 + $0x50] sm:$0xff] }
  0x8d   : > { %v726_v23 = vpack.c.bf16 %v423_v22, %v422_v21  ;;  %v425_v25 = vld [vmem:[#allocation2 + $0x58] sm:$0xff]  ;;  %v426_v27 = vld [vmem:[#allocation2 + $0x60] sm:$0xff] }
  0x8e   : > { %718 = vmatpush3.bf16.msra.mxu0 %v717_v14  ;;  %v729_v26 = vpack.c.bf16 %v425_v25, %v424_v24  ;;  %v427_v28 = vld [vmem:[#allocation2 + $0x68] sm:$0xff]  ;;  %v428_v30 = vld [vmem:[#allocation2 + $0x70] sm:$0xff] }
  0x8f   : > { %719 = vmatprep.subr.bf16.mxu0 %v995_v10  ;;  %v732_v29 = vpack.c.bf16 %v427_v28, %v426_v27  ;;  %v429_v31 = vld [vmem:[#allocation2 + $0x78] sm:$0xff] }
  0x90   : > { %v735_v32 = vpack.c.bf16 %v429_v31, %v428_v30  ;;  %v654_v34 = vld [vmem:[#allocation3] ss:$0 sm:$0xff] }
  0x92   : > { %721 = vmatpush3.bf16.msra.mxu0 %v720_v17 }
  0x93   : > { %722 = vmatprep.subr.bf16.mxu0 %v995_v10 }
  0x96   : > { %724 = vmatpush3.bf16.msra.mxu0 %v723_v20 }
  0x97   : > { %725 = vmatprep.subr.bf16.mxu0 %v995_v10 }
  0x9a   : > { %727 = vmatpush3.bf16.msra.mxu0 %v726_v23 }
  0x9b   : > { %728 = vmatprep.subr.bf16.mxu0 %v995_v10 }
  0x9e   : > { %730 = vmatpush3.bf16.msra.mxu0 %v729_v26 }
  0x9f   : > { %731 = vmatprep.subr.bf16.mxu0 %v995_v10 }
  0xa2   : > { %733 = vmatpush3.bf16.msra.mxu0 %v732_v29 }
  0xa3   : > { %734 = vmatprep.subr.bf16.mxu0 %v995_v10 }
  0xa6   : > { %736 = vmatpush3.bf16.msra.mxu0 %v735_v32 }
  0xa9   : > { %711 = vmatmul.mubr.f32.vlgmr.msra.gmra.mrb[0].mxu0 %v413_v33 }
 0x17c   : > { %v496_v35 = vpop.f32.mrb[0].mxu0 }
 0x17d   : > { %v522_v36 = vadd.f32 %v654_v34, %v496_v35  ;;  %v712_v37 = vpop.f32.mrb[1].mxu0 }
 0x17f   : > { %523 = vst [vmem:[#allocation12] sm:$0xff] %v522_v36 }
 0x180 PF: > { %p1259_p9 = scmp.eq.s32.totalorder %s639_s21, 2  ;;  %s998_s15 = smov [#allocation12]  }
 0x181   : > { %s533_s22 = sshll.u32 %s998_s15, 4  ;;  %s534_s22 = int_to_ptr.vmem [resolvable:$true] %s533_s22 }
 0x182   : > { %s898_s13 = scalar_lea.vmem %s534_s22, 128  ;;  %p905_p10 = scmp.lt.s32.totalorder %s534_s22, %s534_s22 }
 0x183   : > { %p899_p0 = scmp.ne.s32.totalorder %s534_s22, %s898_s13  ;;  %p906_p1 = scmp.lt.s32.totalorder %s898_s13, %s898_s13 }
 0x185   : > { %p900_p3 = pnand %p899_p0, %p1259_p9  ;;  %p907_p2 = por %p906_p1, %p905_p10 }
 0x187   : > { %p901_p6 = pneg %p900_p3 }
 0x189   : > { %p908_p4 = pnand %p907_p2, %p901_p6 }
 0x18b   : > { %911 = shalt.err (!%p908_p4)
}
 0x18c   : > { %s912_s21 = scalar_lea.hbm %s1307_s4, 128 }
 0x18d   : > { %p913_p12 = scmp.ne.s32.totalorder %s1307_s4, %s912_s21  ;;  %p918_p13 = scmp.lt.u32.totalorder %s912_s21, %s1307_s4 }
 0x18f   : > { %p914_p8 = pnand %p913_p12, %p1259_p9 }
 0x191   : > { %p915_p11 = pneg %p914_p8 }
 0x193   : > { %p920_p5 = pnand %p918_p13, %p915_p11 }
 0x195   : > { %923 = shalt.err (!%p920_p5)
}
 0x196   : > { %748 = dma.vmem_to_hbm [thread:$0]  (%p1259_p9), %s534_s22, 128, %s1307_s4, [#allocation7]  }
 0x197   : > { %961 = dma.done.wait (%p1259_p9), [#allocation7], 128  }
 0x198   : > { %963 = vsyncadd (%p1259_p9), [#allocation7], 4294967168 }
 0x199 PF: > { %s20_s20 = sadd.s32 1, %s986_s20   ;;  %s1319_s15 = smov %s970_s16 }
 0x19a   : > { %p17_p7 = scmp.ge.s32.totalorder %s20_s20, 5   ;;  %s1320_s16 = smov %s974_s17 }
 0x19b   : > { %s1321_s17 = smov %s1156_s7  ;;  %s1322_s18 = smov %s982_s19 }
 0x19c   : > { %s1323_s19 = smov %s1325_s30  ;;  %19 = sbr.rel (!%p17_p7) target bundleno = 7 (0x7), region = 116 }
 0x1a3   :  { %546 = vsyncpa [#allocation6], 1 }
 0x1a4   :  { %548 = vsyncpa [#allocation6 + $0x1], 1 }
 0x1a5   :  { %549 = vsyncpa [#allocation11], 1 }
 0x1a6   :  { %551 = vsyncpa [#allocation11 + $0x1], 1 }
 0x1a7   :  { %552 = vsyncpa [#allocation7], 1 }
 0x1a8   :  { %554 = vsyncpa [#allocation7 + $0x1], 1 }
 0x1a9   :  { %555 = vsyncpa [#allocation8], 1 }
 0x1aa   :  { %557 = vsyncpa [#allocation8 + $0x1], 1 }

</bundles_post_ra>
